<compile_context>
chip_gen: v5e
topology: v5e:2x2
jax: 0.10.0
libtpu: 0.0.40
codegen_flags: <defaults>
</compile_context>

<pallas_src>
import functools

import jax
import jax.numpy as jnp
from jax.experimental import pallas as pl
from jax.experimental.pallas import tpu as pltpu


# ---------------------------------------------------------------------------
# Kernels
# ---------------------------------------------------------------------------
def _se_fused_kernel(x_ref, w1t_ref, b1_ref, w2_ref, b2_ref, o_ref, *, inv_hw):
    """Fused pool + gate-MLP + broadcast-multiply on a (nb, Cf, HW) block."""
    x = x_ref[...]                                                    # (nb, Cf, HW)

    # Global average pool over the lane (pixel) axis with f32 accumulation,
    # without materializing an f32 copy of the whole block.
    pooled = jnp.sum(x, axis=-1, keepdims=True, dtype=jnp.float32) * inv_hw

    # conv1x1 (C -> R): channels stay on sublanes (block-diagonal if folded).
    t = w1t_ref[...][None, :, :] * pooled                             # (nb, Cf, Rf)
    h = jnp.sum(t, axis=1, keepdims=True) + b1_ref[...]               # (nb, 1, Rf)
    h = h * jax.nn.sigmoid(h)                                         # SiLU

    # conv1x1 (R -> C) + sigmoid gate.
    u = w2_ref[...][None, :, :] * h                                   # (nb, Cf, Rf)
    g = jax.nn.sigmoid(jnp.sum(u, axis=-1, keepdims=True) + b2_ref[...])  # (nb, Cf, 1)

    # Hot path: exactly one multiply + one store per vreg.
    o_ref[...] = (x * g.astype(x.dtype)).astype(o_ref.dtype)


def _se_pool_kernel(x_ref, sum_ref, *, hw_total, inv_hw):
    """Streaming pass 1: masked partial sums accumulated into the f32 output."""
    t = pl.program_id(1)
    x = x_ref[...]                                                    # (1, Cf, hw_t)
    hw_t = x.shape[-1]
    col = jax.lax.broadcasted_iota(jnp.int32, (1, 1, hw_t), 2) + t * hw_t
    xm = jnp.where(col < hw_total, x, jnp.zeros_like(x))
    part = jnp.sum(xm, axis=-1, keepdims=True, dtype=jnp.float32)     # (1, Cf, 1)

    @pl.when(t == 0)
    def _():
        sum_ref[...] = part

    @pl.when(t > 0)
    def _():
        sum_ref[...] += part

    @pl.when(t == pl.num_programs(1) - 1)
    def _():
        sum_ref[...] *= inv_hw


def _se_scale_kernel(x_ref, g_ref, o_ref):
    """Streaming pass 2: broadcast-multiply by the precomputed per-(n,c) gate."""
    x = x_ref[...]
    o_ref[...] = (x * g_ref[...].astype(x.dtype)).astype(o_ref.dtype)


# ---------------------------------------------------------------------------
# Wrapper-side sizing helpers
# ---------------------------------------------------------------------------
def _cdiv(a, b):
    return -(-a // b)


def _tpu_budget():
    """Return (scoped-VMEM target bytes, multi-TensorCore?) for this backend."""
    try:
        cap = int(pltpu.get_tpu_info().vmem_capacity_bytes)
    except Exception:
        cap = 64 << 20                                  # conservative (v7x per-TC)
    try:
        kind = jax.devices()[0].device_kind.lower()
    except Exception:
        kind = ""
    multi_tc = any(tag in kind for tag in ("v4", "v5p", "v7"))
    # ~112 MiB on 128-MiB parts, ~48 MiB on 64-MiB parts, never above physical.
    target = max(cap * 3 // 4, cap - (16 << 20), 8 << 20)
    return int(target), multi_tc


def _choose_fold(n, c, itemsize):
    """Smallest f | n making f*c a multiple of the sublane pack (else 1)."""
    pack = 8 * max(1, 4 // itemsize)                    # f32: 8, bf16: 16
    if n <= 1 or c % pack == 0:
        return 1
    for f in range(2, pack + 1):
        if n % f == 0 and (c * f) % pack == 0:
            return f
    return 1


def _choose_group_block(n_groups, bytes_per_group, block_budget, multi_tc):
    """Largest batch-group fold fitting the budget; even >=2 steps on multi-TC."""
    nb = max(1, min(n_groups, block_budget // max(bytes_per_group, 1)))
    if multi_tc and n_groups >= 2:
        steps = _cdiv(n_groups, nb)
        if steps == 1:
            nb = _cdiv(n_groups, 2)                     # give both TCs a block
        elif steps % 2:
            nb_alt = _cdiv(n_groups, steps + 1)
            if _cdiv(n_groups, nb_alt) % 2 == 0:
                nb = nb_alt                             # prefer an even step count
    return nb


# ---------------------------------------------------------------------------
# Dispatch paths
# ---------------------------------------------------------------------------
def _se_fused(x_flat, w1t, b1, w2, b2, hw, rf, bytes_per_group, block_budget,
              multi_tc, vmem_limit):
    ng, cf, _ = x_flat.shape
    nb = _choose_group_block(ng, bytes_per_group, block_budget, multi_tc)
    grid = (_cdiv(ng, nb),)          # partial last block: garbage rows discarded
    kernel = functools.partial(_se_fused_kernel, inv_hw=1.0 / hw)
    return pl.pallas_call(
        kernel,
        out_shape=jax.ShapeDtypeStruct((ng, cf, hw), x_flat.dtype),
        grid_spec=pltpu.PrefetchScalarGridSpec(
            num_scalar_prefetch=0,
            grid=grid,
            in_specs=[
                pl.BlockSpec((nb, cf, hw), lambda n: (n, 0, 0)),
                pl.BlockSpec((cf, rf), lambda n: (0, 0)),
                pl.BlockSpec((1, 1, rf), lambda n: (0, 0, 0)),
                pl.BlockSpec((cf, rf), lambda n: (0, 0)),
                pl.BlockSpec((1, cf, 1), lambda n: (0, 0, 0)),
            ],
            out_specs=pl.BlockSpec((nb, cf, hw), lambda n: (n, 0, 0)),
        ),
        compiler_params=pltpu.CompilerParams(
            dimension_semantics=("parallel",),
            vmem_limit_bytes=int(vmem_limit),
        ),
    )(x_flat, w1t, b1.reshape(1, 1, rf), w2, b2.reshape(1, cf, 1))


def _se_streamed(x_flat, w1, b1, w2, b2, n, c, hw, block_budget, vmem_limit):
    """Two-pass HW-tiled path for samples too large for a single VMEM block."""
    ng, cf, _ = x_flat.shape
    itemsize = jnp.dtype(x_flat.dtype).itemsize
    hw_t = (block_budget // max(cf * itemsize, 1)) // 128 * 128
    hw_t = max(128, min(hw_t, _cdiv(hw, 128) * 128))
    n_t = _cdiv(hw, hw_t)

    # Pass 1: streamed global-average pool (f32 accumulation in the revisited
    # output block; masked partial last HW tile).
    pool_kernel = functools.partial(_se_pool_kernel, hw_total=hw, inv_hw=1.0 / hw)
    pooled = pl.pallas_call(
        pool_kernel,
        out_shape=jax.ShapeDtypeStruct((ng, cf, 1), jnp.float32),
        grid_spec=pltpu.PrefetchScalarGridSpec(
            num_scalar_prefetch=0,
            grid=(ng, n_t),
            in_specs=[pl.BlockSpec((1, cf, hw_t), lambda i, t: (i, 0, t))],
            out_specs=pl.BlockSpec((1, cf, 1), lambda i, t: (i, 0, 0)),
        ),
        compiler_params=pltpu.CompilerParams(
            dimension_semantics=("parallel", "arbitrary"),
            vmem_limit_bytes=int(vmem_limit),
        ),
    )(x_flat)

    # Tiny gate MLP (O(N*C*R), off the hot path) in plain XLA, f32.
    p2 = pooled.reshape(n, c)
    h = p2 @ w1.T + b1[None, :]
    h = h * jax.nn.sigmoid(h)
    gate = jax.nn.sigmoid(h @ w2.T + b2[None, :]).reshape(ng, cf, 1)

    # Pass 2: streamed broadcast-multiply.
    return pl.pallas_call(
        _se_scale_kernel,
        out_shape=jax.ShapeDtypeStruct(x_flat.shape, x_flat.dtype),
        grid_spec=pltpu.PrefetchScalarGridSpec(
            num_scalar_prefetch=0,
            grid=(ng, n_t),
            in_specs=[
                pl.BlockSpec((1, cf, hw_t), lambda i, t: (i, 0, t)),
                pl.BlockSpec((1, cf, 1), lambda i, t: (i, 0, 0)),
            ],
            out_specs=pl.BlockSpec((1, cf, hw_t), lambda i, t: (i, 0, t)),
        ),
        compiler_params=pltpu.CompilerParams(
            dimension_semantics=("parallel", "arbitrary"),
            vmem_limit_bytes=int(vmem_limit),
        ),
    )(x_flat, gate)


@functools.partial(jax.jit, static_argnames=("block_budget_bytes",))
def squeeze_excite(x, w1, b1, w2, b2, *, block_budget_bytes=None):
    """x: (N, C, H, W) NCHW; w1: (R, C); b1: (R,); w2: (C, R); b2: (C,).

    Note: for bf16 inputs the final multiply runs in bf16 (gate computed in
    f32), giving last-bit differences vs an all-f32 reference.
    """
    N, C, H, W = x.shape
    HW = H * W
    R = w1.shape[0]
    itemsize = jnp.dtype(x.dtype).itemsize

    vmem_target, multi_tc = _tpu_budget()
    block_budget = (vmem_target - (4 << 20)) // 4       # double-buffered in + out
    if block_budget_bytes is not None:                   # test/tuning override
        block_budget = int(block_budget_bytes)

    # Sublane-density fold: merge f batch samples into the channel axis
    # (free contiguous reshape); weights become block-diagonal.
    f = _choose_fold(N, C, itemsize)
    Ng, Cf, Rf = N // f, f * C, f * R

    w1f, b1f = w1.astype(jnp.float32), b1.astype(jnp.float32)
    w2f, b2f = w2.astype(jnp.float32), b2.astype(jnp.float32)
    if f > 1:
        eye = jnp.eye(f, dtype=jnp.float32)
        w1t_k = jnp.kron(eye, w1f.T)                     # (Cf, Rf) block-diagonal
        w2_k = jnp.kron(eye, w2f)                        # (Cf, Rf) block-diagonal
        b1_k = jnp.tile(b1f, f)                          # (Rf,)
        b2_k = jnp.tile(b2f, f)                          # (Cf,)
    else:
        w1t_k, w2_k, b1_k, b2_k = w1f.T, w2f, b1f, b2f

    x_flat = x.reshape(Ng, Cf, HW)                       # free contiguous reshape
    bytes_per_group = Cf * HW * itemsize

    if bytes_per_group <= block_budget:
        out_flat = _se_fused(x_flat, w1t_k, b1_k, w2_k, b2_k, HW, Rf,
                             bytes_per_group, block_budget, multi_tc, vmem_target)
    else:
        out_flat = _se_streamed(x_flat, w1f, b1f, w2f, b2f, N, C, HW,
                                block_budget, vmem_target)
    return out_flat.reshape(N, C, H, W)


# ---------------------------------------------------------------------------
# Reference + self-test
# ---------------------------------------------------------------------------
def _reference(x, w1, b1, w2, b2):
    xf = x.astype(jnp.float32)
    pooled = jnp.mean(xf, axis=(2, 3))                         # (N, C)
    h = pooled @ w1.T + b1[None, :]                            # (N, R)
    h = h * jax.nn.sigmoid(h)                                  # SiLU
    g = jax.nn.sigmoid(h @ w2.T + b2[None, :])                 # (N, C)
    return (xf * g[:, :, None, None]).astype(x.dtype)


def _make_params(key, C, reduction=4, dtype=jnp.float32):
    R = max(1, C // reduction)
    k1, k2, k3, k4 = jax.random.split(key, 4)
    w1 = 0.3 * jax.random.normal(k1, (R, C), dtype=dtype)      # conv_nd(C -> R, k=1)
    b1 = 0.1 * jax.random.normal(k2, (R,), dtype=dtype)
    w2 = 0.3 * jax.random.normal(k3, (C, R), dtype=dtype)      # conv_nd(R -> C, k=1)
    b2 = 0.1 * jax.random.normal(k4, (C,), dtype=dtype)
    return w1, b1, w2, b2


if __name__ == "__main__":
    key = jax.random.PRNGKey(0)
    k = jax.random.split(key, 6)

    # Case 1: canonical small shape; C=4 exercises the sublane batch fold,
    # HW=256 is lane-dense.
    N, C, H, W = 2, 4, 16, 16
    x = jax.random.normal(k[0], (N, C, H, W), dtype=jnp.float32)
    w1, b1, w2, b2 = _make_params(k[1], C)
    out = jax.block_until_ready(squeeze_excite(x, w1, b1, w2, b2))
    ref = _reference(x, w1, b1, w2, b2)
    assert out.shape == (N, C, H, W)
    assert jnp.allclose(out, ref, atol=1e-5, rtol=1e-5), "mismatch vs reference (case 1)"

    # Case 2: HW not a multiple of 128, C not a multiple of 8, odd N
    # (padded lanes/sublanes + cdiv remainder batch block).
    N2, C2, H2, W2 = 3, 6, 14, 14
    x2 = jax.random.normal(k[2], (N2, C2, H2, W2), dtype=jnp.float32)
    w1b, b1b, w2b, b2b = _make_params(k[3], C2)
    out2 = jax.block_until_ready(squeeze_excite(x2, w1b, b1b, w2b, b2b))
    ref2 = _reference(x2, w1b, b1b, w2b, b2b)
    assert out2.shape == (N2, C2, H2, W2)
    assert jnp.allclose(out2, ref2, atol=1e-5, rtol=1e-5), "mismatch vs reference (case 2)"

    # Case 3: force the HW-streaming two-pass path via a small budget override
    # (per-sample block > budget; partial last HW tile exercises masking).
    N3, C3, H3, W3 = 1, 256, 56, 56
    x3 = jax.random.normal(k[4], (N3, C3, H3, W3), dtype=jnp.float32)
    w1c, b1c, w2c, b2c = _make_params(k[5], C3)
    out3 = jax.block_until_ready(
        squeeze_excite(x3, w1c, b1c, w2c, b2c, block_budget_bytes=1 << 20))
    ref3 = _reference(x3, w1c, b1c, w2c, b2c)
    assert out3.shape == (N3, C3, H3, W3)
    assert jnp.allclose(out3, ref3, atol=1e-5, rtol=1e-5), "mismatch vs reference (case 3)"

    print("KERNEL_OK")
</pallas_src>

<mosaic_0001>
module attributes {stable_mosaic.version = 11 : i64} {
  func.func @_se_fused_kernel(%arg0: i32, %arg1: memref<1x8x256xf32, #tpu.memory_space<vmem>>, %arg2: memref<8x2xf32, #tpu.memory_space<vmem>>, %arg3: memref<1x1x2xf32, #tpu.memory_space<vmem>>, %arg4: memref<8x2xf32, #tpu.memory_space<vmem>>, %arg5: memref<1x8x1xf32, #tpu.memory_space<vmem>>, %arg6: memref<1x8x256xf32, #tpu.memory_space<vmem>>) attributes {dimension_semantics = [#tpu.dimension_semantics<parallel>], iteration_bounds = array<i64: 1>, scalar_prefetch = 0 : i64, scratch_operands = 0 : i64, tpu.core_type = #tpu.core_type<tc>, window_params = [{transform_indices = @transform_0, window_bounds = array<i64: 1, 8, 256>}, {pipeline_mode = #tpu.pipeline_mode<synchronous>, transform_indices = @transform_1, window_bounds = array<i64: 8, 2>}, {pipeline_mode = #tpu.pipeline_mode<synchronous>, transform_indices = @transform_2, window_bounds = array<i64: 1, 1, 2>}, {pipeline_mode = #tpu.pipeline_mode<synchronous>, transform_indices = @transform_3, window_bounds = array<i64: 8, 2>}, {pipeline_mode = #tpu.pipeline_mode<synchronous>, transform_indices = @transform_4, window_bounds = array<i64: 1, 8, 1>}, {transform_indices = @transform_5, window_bounds = array<i64: 1, 8, 256>}]} {
    %c0 = arith.constant 0 : index
    %c0_0 = arith.constant 0 : index
    %c0_1 = arith.constant 0 : index
    %0 = vector.load %arg1[%c0, %c0_0, %c0_1] : memref<1x8x256xf32, #tpu.memory_space<vmem>>, vector<1x8x256xf32>
    %cst = arith.constant dense<0.000000e+00> : vector<1x8xf32>
    %1 = vector.multi_reduction <add>, %0, %cst [2] : vector<1x8x256xf32> to vector<1x8xf32>
    %2 = vector.shape_cast %1 : vector<1x8xf32> to vector<1x8x1xf32>
    %cst_2 = arith.constant 3.906250e-03 : f32
    %3 = vector.broadcast %cst_2 : f32 to vector<1x8x1xf32>
    %4 = arith.mulf %2, %3 : vector<1x8x1xf32>
    %c0_3 = arith.constant 0 : index
    %c0_4 = arith.constant 0 : index
    %5 = vector.load %arg2[%c0_3, %c0_4] : memref<8x2xf32, #tpu.memory_space<vmem>>, vector<8x2xf32>
    %6 = vector.shape_cast %5 : vector<8x2xf32> to vector<1x8x2xf32>
    %7 = vector.broadcast %4 : vector<1x8x1xf32> to vector<1x8x2xf32>
    %8 = arith.mulf %6, %7 : vector<1x8x2xf32>
    %cst_5 = arith.constant dense<0.000000e+00> : vector<1x2xf32>
    %9 = vector.multi_reduction <add>, %8, %cst_5 [1] : vector<1x8x2xf32> to vector<1x2xf32>
    %10 = vector.shape_cast %9 : vector<1x2xf32> to vector<1x1x2xf32>
    %c0_6 = arith.constant 0 : index
    %c0_7 = arith.constant 0 : index
    %c0_8 = arith.constant 0 : index
    %11 = vector.load %arg3[%c0_6, %c0_7, %c0_8] : memref<1x1x2xf32, #tpu.memory_space<vmem>>, vector<1x1x2xf32>
    %12 = arith.addf %10, %11 : vector<1x1x2xf32>
    %13 = arith.negf %12 : vector<1x1x2xf32>
    %14 = math.exp %13 : vector<1x1x2xf32>
    %cst_9 = arith.constant 1.000000e+00 : f32
    %15 = vector.broadcast %cst_9 : f32 to vector<1x1x2xf32>
    %16 = arith.addf %15, %14 : vector<1x1x2xf32>
    %17 = arith.divf %15, %16 : vector<1x1x2xf32>
    %18 = arith.mulf %12, %17 : vector<1x1x2xf32>
    %c0_10 = arith.constant 0 : index
    %c0_11 = arith.constant 0 : index
    %19 = vector.load %arg4[%c0_10, %c0_11] : memref<8x2xf32, #tpu.memory_space<vmem>>, vector<8x2xf32>
    %20 = vector.shape_cast %19 : vector<8x2xf32> to vector<1x8x2xf32>
    %21 = vector.broadcast %18 : vector<1x1x2xf32> to vector<1x8x2xf32>
    %22 = arith.mulf %20, %21 : vector<1x8x2xf32>
    %cst_12 = arith.constant dense<0.000000e+00> : vector<1x8xf32>
    %23 = vector.multi_reduction <add>, %22, %cst_12 [2] : vector<1x8x2xf32> to vector<1x8xf32>
    %24 = vector.shape_cast %23 : vector<1x8xf32> to vector<1x8x1xf32>
    %c0_13 = arith.constant 0 : index
    %c0_14 = arith.constant 0 : index
    %c0_15 = arith.constant 0 : index
    %25 = vector.load %arg5[%c0_13, %c0_14, %c0_15] : memref<1x8x1xf32, #tpu.memory_space<vmem>>, vector<1x8x1xf32>
    %26 = arith.addf %24, %25 : vector<1x8x1xf32>
    %27 = arith.negf %26 : vector<1x8x1xf32>
    %28 = math.exp %27 : vector<1x8x1xf32>
    %cst_16 = arith.constant 1.000000e+00 : f32
    %29 = vector.broadcast %cst_16 : f32 to vector<1x8x1xf32>
    %30 = arith.addf %29, %28 : vector<1x8x1xf32>
    %31 = arith.divf %29, %30 : vector<1x8x1xf32>
    %32 = vector.broadcast %31 : vector<1x8x1xf32> to vector<1x8x256xf32>
    %33 = arith.mulf %0, %32 : vector<1x8x256xf32>
    %c0_17 = arith.constant 0 : index
    %c0_18 = arith.constant 0 : index
    %c0_19 = arith.constant 0 : index
    %34 = vector.load %arg6[%c0_17, %c0_18, %c0_19] : memref<1x8x256xf32, #tpu.memory_space<vmem>>, vector<1x8x256xf32>
    tpu.vector_store %arg6[%c0_17, %c0_18, %c0_19], %33 {strides = array<i32>} : memref<1x8x256xf32, #tpu.memory_space<vmem>>, vector<1x8x256xf32>,
    return
  }
  func.func @transform_0(%arg0: i32) -> (i32, i32, i32) {
    %c0_i32 = arith.constant 0 : i32
    %c0_i32_0 = arith.constant 0 : i32
    %c0_i32_1 = arith.constant 0 : i32
    return %arg0, %c0_i32, %c0_i32_0 : i32, i32, i32
  }
  func.func @transform_1(%arg0: i32) -> (i32, i32) {
    %c0_i32 = arith.constant 0 : i32
    %c0_i32_0 = arith.constant 0 : i32
    %c0_i32_1 = arith.constant 0 : i32
    return %c0_i32, %c0_i32_0 : i32, i32
  }
  func.func @transform_2(%arg0: i32) -> (i32, i32, i32) {
    %c0_i32 = arith.constant 0 : i32
    %c0_i32_0 = arith.constant 0 : i32
    %c0_i32_1 = arith.constant 0 : i32
    %c0_i32_2 = arith.constant 0 : i32
    return %c0_i32, %c0_i32_0, %c0_i32_1 : i32, i32, i32
  }
  func.func @transform_3(%arg0: i32) -> (i32, i32) {
    %c0_i32 = arith.constant 0 : i32
    %c0_i32_0 = arith.constant 0 : i32
    %c0_i32_1 = arith.constant 0 : i32
    return %c0_i32, %c0_i32_0 : i32, i32
  }
  func.func @transform_4(%arg0: i32) -> (i32, i32, i32) {
    %c0_i32 = arith.constant 0 : i32
    %c0_i32_0 = arith.constant 0 : i32
    %c0_i32_1 = arith.constant 0 : i32
    %c0_i32_2 = arith.constant 0 : i32
    return %c0_i32, %c0_i32_0, %c0_i32_1 : i32, i32, i32
  }
  func.func @transform_5(%arg0: i32) -> (i32, i32, i32) {
    %c0_i32 = arith.constant 0 : i32
    %c0_i32_0 = arith.constant 0 : i32
    %c0_i32_1 = arith.constant 0 : i32
    return %arg0, %c0_i32, %c0_i32_0 : i32, i32, i32
  }
}

</mosaic_0001>

<bundles_post_ra>
// kernel: tile.0
= control target key start
LH: loop header
LB: loop body
LE: loop exit
PB: predicated region body
PF: predicated region fallthrough
CT: control target
= control target key end

     0   :  { %s34_s8 = smov 125   ;;  %s35_s9 = smov 126   ;;  %vm7_vm0 = vcmask 7168   ;;  %s61_s0 = inlined_call_operand.vmem [shape: f32[2,4], index: 0, kind: input, shape index: {}]   ;;  %s62_s1 = inlined_call_operand.vmem [shape: f32[1,8,1], index: 1, kind: output, shape index: {}]  }
   0x1   :  { %v4_v0 = vld [vmem:[%s61_s0] sm:$0x3]  ;;  %s33_s0 = smov 127  }
   0x2   :  { %5 = vst [vmem:[#allocation0] sm:$0x3] %v4_v0 }
   0x9   :  { %v9_v1 = vld [vmem:[#allocation0] sm:$0x3]  }
   0xa   :  { %v21_v2 = vld [vmem:[#allocation0] sm:$0x3]   ;;  %10 = vrot.lane.b32.xlu0 %v9_v1, %s33_s0 }
   0xb   :  { %22 = vrot.lane.b32.xlu1 %v21_v2, %s34_s8  ;;  %v15_v3 = vld [vmem:[#allocation0] sm:$0x3]  }
   0xc   :  { %v6_v4 = vld [vmem:[#allocation0] sm:$0x3]  }
   0xd   :  { %8 = vst.msk [vmem:[%s62_s1] ss:$4 sm:$0x3] %vm7_vm0, %v6_v4  }
  0x12   :  { %16 = vrot.lane.b32.xlu0 %v15_v3, %s35_s9 }
  0x7c   :  { %v11_v5 = vpop.permute.xlu0 %10  }
  0x7d   :  { %v23_v6 = vpop.permute.xlu1 %22   ;;  %27 = vst.msk [vmem:[%s62_s1 + $0x1] ss:$4 sm:$0x3] %vm7_vm0, %v11_v5  }
  0x7e   :  { %29 = vst.msk [vmem:[%s62_s1 + $0x3] ss:$4 sm:$0x3] %vm7_vm0, %v23_v6  }
  0x84   :  { %v17_v7 = vpop.permute.xlu0 %16  }
  0x85   :  { %28 = vst.msk [vmem:[%s62_s1 + $0x2] ss:$4 sm:$0x3] %vm7_vm0, %v17_v7  }

// kernel: squeeze_excite.1
= control target key start
LH: loop header
LB: loop body
LE: loop exit
PB: predicated region body
PF: predicated region fallthrough
CT: control target
= control target key end

     0   :  { %vm28_vm0 = vcmask 15360   ;;  %v111_v34 = vmov 0   ;;  %s176_s0 = inlined_call_operand.vmem [shape: f32[1,8,256], index: 0, kind: input, shape index: {}]   ;;  %s177_s1 = inlined_call_operand.vmem [shape: f32[8,2], index: 1, kind: input, shape index: {}]   ;;  %s178_s2 = inlined_call_operand.vmem [shape: f32[1,1,2], index: 2, kind: input, shape index: {}]   ;;  %s179_s3 = inlined_call_operand.vmem [shape: f32[8,2], index: 3, kind: input, shape index: {}]   ;;  %s180_s4 = inlined_call_operand.vmem [shape: f32[1,8,1], index: 4, kind: input, shape index: {}]   ;;  %s181_s5 = inlined_call_operand.vmem [shape: f32[1,8,256], index: 5, kind: output, shape index: {}]  }
   0x1   :  { %v145_v0 = vld [vmem:[%s176_s0] sm:$0xff]  ;;  %v150_v1 = vld [vmem:[%s176_s0 + $0x8] sm:$0xff]  ;;  %101 = vset.pattern.permute.xlu1 %v111_v34  ;;  %102 = vset.pattern.permute.xlu0 %v111_v34 }
   0x2   :  { %v22_v2 = vadd.f32 %v150_v1, %v145_v0  ;;  %v26_v3 = vld [vmem:[%s177_s1] sm:$0xff] }
   0x3   :  { %v36_v13 = vld [vmem:[%s178_s2] sm:$0x1] }
   0x4   :  { %23 = vadd.xlane.f32.xlu0 %v22_v2  ;;  %v58_v30 = vld [vmem:[%s179_s3] sm:$0xff] }
   0x5   :  { %v64_v35 = vld [vmem:[%s180_s4] sm:$0xff] }
  0x77   :  { %v24_v4 = vpop.xlane.xlu0 %23 }
  0x78   :  { %v25_v5 = vmul.f32 0.00390625, %v24_v4 }
  0x7a   :  { %v27_v6 = vmul.f32 %v26_v3, %v25_v5 }
  0x7c   :  { %v29_v7 = vsel %vm28_vm0, %v27_v6, 0.0 }
  0x7d   :  { %v30_v8 = vrot.slane %v29_v7, 4 }
  0x7f   :  { %v31_v9 = vadd.f32 %v30_v8, %v29_v7 }
  0x81   :  { %v32_v10 = vrot.slane %v31_v9, 2 }
  0x83   :  { %v33_v11 = vadd.f32 %v32_v10, %v31_v9 }
  0x85   :  { %v34_v12 = vrot.slane %v33_v11, 1 }
  0x87   :  { %v35_v14 = vadd.f32 %v34_v12, %v33_v11 }
  0x89   :  { %v37_v15 = vadd.f32 %v36_v13, %v35_v14 }
  0x8b   :  { %v98_v16 = vmul.f32 -1.442695, %v37_v15 }
  0x8d   :  { %103 = vpow2.f32 %v98_v16 }
  0x93   :  { %v104_v17 = vpop.eup %103 }
  0x94   :  { %v41_v18 = vadd.f32 1.0, %v104_v17 }
  0x96   :  { %105 = vrcp.f32 %v41_v18  ;;  %v53_v22 = vand.u32 2147483648, %v41_v18  ;;  %v51_v24 = vand.u32 2147483647, %v41_v18  ;;  %vm47_vm2 = vweird.f32 %v41_v18 }
  0x98   :  { %v54_v26 = vor.u32 1.1754944e-38, %v53_v22  ;;  %vm52_vm4 = vcmp.eq.f32.partialorder %v51_v24, 8.507059e+37 }
  0x9c   :  { %v106_v19 = vpop.eup %105 }
  0x9d   :  { %v43_v20 = vmul.f32 %v106_v19, %v41_v18  ;;  %vm48_vm1 = vweird.f32 %v106_v19 }
  0x9e   :  { %vm49_vm3 = vmor %vm47_vm2, %vm48_vm1 }
  0x9f   :  { %v44_v21 = vsub.f32 1.0, %v43_v20 }
  0xa1   :  { %v45_v23 = vmul.f32 %v106_v19, %v44_v21 }
  0xa3   :  { %v46_v25 = vadd.f32 %v106_v19, %v45_v23 }
  0xa5   :  { %v50_v27 = vsel %vm49_vm3, %v106_v19, %v46_v25 }
  0xa6   :  { %v55_v28 = vsel %vm52_vm4, %v54_v26, %v50_v27 }
  0xa7   :  { %v57_v29 = vmul.f32 %v55_v28, %v37_v15 }
  0xa9   :  { %v59_v31 = vperm.slane %v57_v29, 0 }
  0xab   :  { %v60_v32 = vmul.f32 %v59_v31, %v58_v30 }
  0xad   :  { %v61_v33 = vsel %vm28_vm0, %v60_v32, 0.0 }
  0xae   :  { %62 = vadd.xlane.f32.xlu0 %v61_v33 }
 0x121   :  { %v63_v36 = vpop.xlane.xlu0 %62 }
 0x122   :  { %v65_v37 = vadd.f32 %v64_v35, %v63_v36 }
 0x124   :  { %v99_v38 = vmul.f32 -1.442695, %v65_v37 }
 0x126   :  { %107 = vpow2.f32 %v99_v38 }
 0x12c   :  { %v108_v39 = vpop.eup %107 }
 0x12d   :  { %v69_v40 = vadd.f32 1.0, %v108_v39 }
 0x12f   :  { %109 = vrcp.f32 %v69_v40  ;;  %v81_v44 = vand.u32 2147483648, %v69_v40  ;;  %v79_v46 = vand.u32 2147483647, %v69_v40  ;;  %vm75_vm6 = vweird.f32 %v69_v40 }
 0x131   :  { %v82_v48 = vor.u32 1.1754944e-38, %v81_v44  ;;  %vm80_vm8 = vcmp.eq.f32.partialorder %v79_v46, 8.507059e+37 }
 0x135   :  { %v110_v41 = vpop.eup %109 }
 0x136   :  { %v71_v42 = vmul.f32 %v110_v41, %v69_v40  ;;  %vm76_vm5 = vweird.f32 %v110_v41 }
 0x137   :  { %vm77_vm7 = vmor %vm75_vm6, %vm76_vm5 }
 0x138   :  { %v72_v43 = vsub.f32 1.0, %v71_v42 }
 0x13a   :  { %v73_v45 = vmul.f32 %v110_v41, %v72_v43 }
 0x13c   :  { %v74_v47 = vadd.f32 %v110_v41, %v73_v45 }
 0x13e   :  { %v78_v49 = vsel %vm77_vm7, %v110_v41, %v74_v47 }
 0x13f   :  { %v83_v50 = vsel %vm80_vm8, %v82_v48, %v78_v49 }
 0x140   :  { %87 = vperm.xlu1 %101, %v83_v50  }
 0x1b2   :  { %v88_v51 = vpop.permute.xlu1 %87 }
 0x1b3   :  { %v90_v52 = vmul.f32 %v88_v51, %v145_v0  ;;  %v91_v53 = vmul.f32 %v88_v51, %v150_v1 }
 0x1b5   :  { %92 = vst [vmem:[%s181_s5] sm:$0xff] %v90_v52 }
 0x1b6   :  { %93 = vst [vmem:[%s181_s5 + $0x8] sm:$0xff] %v91_v53 }

</bundles_post_ra>
